<compile_context>
chip_gen: v6e
topology: v6e:2x2x1
jax: 0.10.0
libtpu: 0.0.40
codegen_flags: <defaults>
</compile_context>

<pallas_src>
import math

import jax
import jax.numpy as jnp
from jax.experimental import pallas as pl
from jax.experimental.pallas import tpu as pltpu


def _make_kernel(fuse_softmax):
    """Kernel for one (batch-block, T-block) grid point.

    eh_ref  : (tb, H)      f32   hidden @ W1.T + bias   (hoisted to wrapper)
    enc_ref : (tb, tt, H)  mxu   encoder rows for this block
    w2t_ref : (H, H)       mxu   attn.weight[:, H:].T   (encoder part)
    v_ref   : (1, H)       f32   v parameter as a lane-dense row
    out_ref : (tb, tt)     f32   softmax probs (fused) or raw scores
    """

    def kernel(eh_ref, enc_ref, w2t_ref, v_ref, out_ref):
        tb, tt, h = enc_ref.shape

        # Encoder projection: one big (tb*tt, H) @ (H, H) MXU matmul.
        enc2d = enc_ref[...].reshape(tb * tt, h)
        e_e = jnp.dot(enc2d, w2t_ref[...],
                      preferred_element_type=jnp.float32)        # (tb*tt, H) f32

        # energy = relu(encoder part + hidden part); bias already in e_h.
        energy = jnp.maximum(
            e_e.reshape(tb, tt, h) + eh_ref[...][:, None, :], 0.0)  # (tb, tt, H)

        # score[b, t] = <energy[b, t, :], v>  — VPU multiply + lane reduce.
        scores = jnp.sum(energy * v_ref[...], axis=-1)           # (tb, tt) f32

        if fuse_softmax:
            # Whole T extent is in this block: fused, exact softmax.
            m = jnp.max(scores, axis=-1, keepdims=True)
            p = jnp.exp(scores - m)
            out_ref[...] = (p / jnp.sum(p, axis=-1, keepdims=True)
                            ).astype(out_ref.dtype)
        else:
            # Long-T path: emit raw scores; softmax happens in the wrapper.
            out_ref[...] = scores.astype(out_ref.dtype)

    return kernel


def _vmem_limit_bytes():
    """Scoped-VMEM limit derived from the chip's physical VMEM capacity."""
    try:
        cap = getattr(pltpu.get_tpu_info(), "vmem_capacity_bytes", None)
    except Exception:  # pragma: no cover - emulator / query failure
        cap = None
    if not cap:
        cap = 64 * 1024 * 1024          # conservative (v7x per-core) fallback
    return int(min((cap * 3) // 4, 96 * 1024 * 1024))


def _select_tiles(B, T, H, enc_itemsize, vmem_budget):
    """Pick (tb, tt) so one block's working set fits `vmem_budget` bytes.

    Working set counted per block: double-buffered encoder tile, the f32
    intermediates (e_e, energy), double-buffered (H, H) weight, small vectors.
    """
    def round8_down(x):
        return max(8, (x // 8) * 8)

    weights = 2 * H * H * enc_itemsize + 8 * H * 4
    per_row = H * (2 * enc_itemsize + 2 * 4) + 2 * 4
    rows = max(8, (vmem_budget - weights) // per_row)

    # Prefer covering the whole T extent in one step (lets the softmax fuse).
    if T * min(B, 8) <= rows:
        if B <= 8:
            tb = B
        else:
            tb = min(B, round8_down(rows // T))
            # Give 2-TensorCore chips (v7x) at least two batch grid steps.
            if tb >= B and B >= 16:
                tb = round8_down(-(-B // 2))
        return tb, T

    # Long sequence: tile T.  tt < T must be a multiple of 128 (lane-dense
    # output, sublane-aligned encoder block).
    tb = B if B <= 8 else 8
    if T < 256:
        return tb, T
    tt = max(128, ((rows // tb) // 128) * 128)
    tt = min(tt, (T // 128) * 128)
    return tb, tt


def attention_forward(hidden, encoder_outputs, attn_weight, attn_bias, v,
                      *, mxu_dtype=jnp.bfloat16):
    """Pallas implementation of Attention.forward.

    hidden:          (B, H)
    encoder_outputs: (B, T, H)
    attn_weight:     (H, 2H)   nn.Linear(2H, H).weight
    attn_bias:       (H,)      nn.Linear(2H, H).bias
    v:               (H,)
    mxu_dtype:       dtype of the MXU operands for the dominant encoder
                     stream (default bf16 — the kernel is HBM-bound, so this
                     is ~2x end to end).  Pass jnp.float32 to match the
                     PyTorch `.to(torch.float32)` semantics exactly.
                     Accumulation, relu and softmax are always f32.
    returns:         (B, 1, T) float32 attention weights.
    """
    B, T, H = encoder_outputs.shape
    assert hidden.shape == (B, H)
    assert attn_weight.shape == (H, 2 * H)

    enc_dtype = jnp.float32 if mxu_dtype is None else jnp.dtype(mxu_dtype)
    enc_sz = jnp.dtype(enc_dtype).itemsize

    # Split the Linear(2H->H) weight for the concatenated [hidden, enc] input.
    w1 = attn_weight[:, :H].astype(jnp.float32)          # multiplies hidden
    w2t = attn_weight[:, H:].T.astype(enc_dtype)          # multiplies encoder

    # Hidden projection + bias hoisted out of the kernel (O(B*H^2), a factor T
    # smaller than the encoder matmul) — done once, in full f32.
    e_h = (jnp.dot(hidden.astype(jnp.float32), w1.T,
                   precision=jax.lax.Precision.HIGHEST)
           + attn_bias.astype(jnp.float32))                # (B, H) f32

    v_row = v.reshape(1, H).astype(jnp.float32)
    enc = encoder_outputs.astype(enc_dtype)

    vmem_limit = _vmem_limit_bytes()
    tb, tt = _select_tiles(B, T, H, enc_sz, (vmem_limit * 3) // 5)
    n_b = pl.cdiv(B, tb)
    n_t = pl.cdiv(T, tt)
    fuse_softmax = (n_t == 1)

    cost = pl.CostEstimate(
        flops=2 * B * T * H * H + 4 * B * T * H,
        transcendentals=B * T,
        bytes_accessed=(B * T * H * enc_sz + H * H * enc_sz
                        + B * H * 4 + H * 4 + B * T * 4))

    scores = pl.pallas_call(
        _make_kernel(fuse_softmax),
        out_shape=jax.ShapeDtypeStruct((B, T), jnp.float32),
        grid=(n_b, n_t),
        in_specs=[
            pl.BlockSpec((tb, H), lambda i, j: (i, 0)),        # e_h block
            pl.BlockSpec((tb, tt, H), lambda i, j: (i, j, 0)),  # encoder block
            pl.BlockSpec((H, H), lambda i, j: (0, 0)),          # W2.T (resident)
            pl.BlockSpec((1, H), lambda i, j: (0, 0)),          # v row (resident)
        ],
        # Lane-dense (tb, tt) output, T on the lane axis.  (For T < 128 the
        # store is a masked partial vst — negligible at such sizes.)
        out_specs=pl.BlockSpec((tb, tt), lambda i, j: (i, j)),
        compiler_params=pltpu.CompilerParams(
            dimension_semantics=("parallel", "parallel"),
            vmem_limit_bytes=vmem_limit),
        cost_estimate=cost,
    )(e_h, enc, w2t, v_row)

    if fuse_softmax:
        out = scores
    else:
        # Cheap epilogue: (B, T) is H-times smaller than the encoder stream.
        out = jax.nn.softmax(scores, axis=-1)

    # (B, T) -> (B, 1, T): pure reshape, T already on the lane axis.
    return out[:, None, :]


def attention_reference(hidden, encoder_outputs, attn_weight, attn_bias, v):
    """Pure-JAX reference (mirrors the PyTorch forward)."""
    B, T, H = encoder_outputs.shape
    h = jnp.broadcast_to(hidden[:, None, :], (B, T, H))
    cat = jnp.concatenate([h, encoder_outputs], axis=2).astype(jnp.float32)
    energy = jax.nn.relu(
        jnp.einsum("btk,hk->bth", cat, attn_weight.astype(jnp.float32),
                   precision=jax.lax.Precision.HIGHEST)
        + attn_bias.astype(jnp.float32))                       # (B, T, H)
    scores = jnp.einsum("bth,h->bt", energy, v.astype(jnp.float32),
                        precision=jax.lax.Precision.HIGHEST)
    return jax.nn.softmax(scores, axis=1)[:, None, :]          # (B, 1, T)


if __name__ == "__main__":
    B, T, H = 2, 8, 32

    key = jax.random.PRNGKey(0)
    k_hid, k_enc, k_w, k_b, k_v = jax.random.split(key, 5)

    hidden = jax.random.normal(k_hid, (B, H), dtype=jnp.float32)
    encoder_outputs = jax.random.normal(k_enc, (B, T, H), dtype=jnp.float32)

    # nn.Linear(2H, H): weight (H, 2H), bias (H,), uniform(-1/sqrt(2H), 1/sqrt(2H))
    lin_std = 1.0 / math.sqrt(2 * H)
    attn_weight = jax.random.uniform(
        k_w, (H, 2 * H), minval=-lin_std, maxval=lin_std, dtype=jnp.float32)
    attn_bias = jax.random.uniform(
        k_b, (H,), minval=-lin_std, maxval=lin_std, dtype=jnp.float32)

    # v ~ uniform(-1/sqrt(H), 1/sqrt(H))
    v_std = 1.0 / math.sqrt(H)
    v_param = jax.random.uniform(
        k_v, (H,), minval=-v_std, maxval=v_std, dtype=jnp.float32)

    ref = attention_reference(hidden, encoder_outputs, attn_weight, attn_bias,
                              v_param)

    # Exact-f32 operand path (matches the PyTorch .to(float32) semantics).
    out_f32 = attention_forward(hidden, encoder_outputs, attn_weight,
                                attn_bias, v_param, mxu_dtype=jnp.float32)
    out_f32 = jax.block_until_ready(out_f32)
    assert out_f32.shape == (B, 1, T), out_f32.shape
    assert jnp.allclose(out_f32, ref, atol=5e-3, rtol=1e-2), "f32 mismatch"
    assert jnp.allclose(jnp.sum(out_f32, axis=-1), 1.0, atol=1e-4)

    # Default path: bf16 MXU operands (mem-bound kernel -> ~2x HBM win);
    # relu/softmax stay f32, softmax uses an exact divide.
    out = attention_forward(hidden, encoder_outputs, attn_weight, attn_bias,
                            v_param)
    out = jax.block_until_ready(out)
    assert out.shape == (B, 1, T), out.shape
    assert bool(jnp.all(jnp.isfinite(out)))
    assert jnp.allclose(jnp.sum(out, axis=-1), 1.0, atol=1e-4)
    assert jnp.allclose(out, ref, atol=5e-2, rtol=1e-1), "bf16 mismatch"

    print("KERNEL_OK")
</pallas_src>

<mosaic_0001>
module attributes {stable_mosaic.version = 11 : i64} {
  func.func @kernel(%arg0: i32, %arg1: i32, %arg2: memref<2x32xf32, #tpu.memory_space<vmem>>, %arg3: memref<2x8x32xf32, #tpu.memory_space<vmem>>, %arg4: memref<32x32xf32, #tpu.memory_space<vmem>>, %arg5: memref<1x32xf32, #tpu.memory_space<vmem>>, %arg6: memref<2x8xf32, #tpu.memory_space<vmem>>) attributes {dimension_semantics = [#tpu.dimension_semantics<parallel>, #tpu.dimension_semantics<parallel>], iteration_bounds = array<i64: 1, 1>, scalar_prefetch = 0 : i64, scratch_operands = 0 : i64, tpu.core_type = #tpu.core_type<tc>, window_params = [{transform_indices = @transform_0, window_bounds = array<i64: 2, 32>}, {transform_indices = @transform_1, window_bounds = array<i64: 2, 8, 32>}, {pipeline_mode = #tpu.pipeline_mode<synchronous>, transform_indices = @transform_2, window_bounds = array<i64: 32, 32>}, {pipeline_mode = #tpu.pipeline_mode<synchronous>, transform_indices = @transform_3, window_bounds = array<i64: 1, 32>}, {transform_indices = @transform_4, window_bounds = array<i64: 2, 8>}]} {
    %c0 = arith.constant 0 : index
    %c0_0 = arith.constant 0 : index
    %c0_1 = arith.constant 0 : index
    %0 = vector.load %arg3[%c0, %c0_0, %c0_1] : memref<2x8x32xf32, #tpu.memory_space<vmem>>, vector<2x8x32xf32>
    %1 = vector.shape_cast %0 : vector<2x8x32xf32> to vector<16x32xf32>
    %c0_2 = arith.constant 0 : index
    %c0_3 = arith.constant 0 : index
    %2 = vector.load %arg4[%c0_2, %c0_3] : memref<32x32xf32, #tpu.memory_space<vmem>>, vector<32x32xf32>
    %cst = arith.constant dense<0.000000e+00> : vector<16x32xf32>
    %3 = tpu.matmul %1, %2, %cst {dimension_numbers = #tpu.dot_dimension_numbers<[1], [0], [0], [1], [0, 0, 1, 1], [], []>} : vector<16x32xf32>, vector<32x32xf32>, vector<16x32xf32> -> vector<16x32xf32>
    %4 = vector.shape_cast %3 : vector<16x32xf32> to vector<2x8x32xf32>
    %c0_4 = arith.constant 0 : index
    %c0_5 = arith.constant 0 : index
    %5 = vector.load %arg2[%c0_4, %c0_5] : memref<2x32xf32, #tpu.memory_space<vmem>>, vector<2x32xf32>
    %6 = vector.shape_cast %5 : vector<2x32xf32> to vector<2x1x32xf32>
    %7 = vector.broadcast %6 : vector<2x1x32xf32> to vector<2x8x32xf32>
    %8 = arith.addf %4, %7 : vector<2x8x32xf32>
    %cst_6 = arith.constant 0.000000e+00 : f32
    %9 = vector.broadcast %cst_6 : f32 to vector<2x8x32xf32>
    %10 = arith.maximumf %8, %9 : vector<2x8x32xf32>
    %c0_7 = arith.constant 0 : index
    %c0_8 = arith.constant 0 : index
    %11 = vector.load %arg5[%c0_7, %c0_8] : memref<1x32xf32, #tpu.memory_space<vmem>>, vector<1x32xf32>
    %12 = vector.shape_cast %11 : vector<1x32xf32> to vector<1x1x32xf32>
    %13 = vector.broadcast %12 : vector<1x1x32xf32> to vector<2x8x32xf32>
    %14 = arith.mulf %10, %13 : vector<2x8x32xf32>
    %cst_9 = arith.constant dense<0.000000e+00> : vector<2x8xf32>
    %15 = vector.multi_reduction <add>, %14, %cst_9 [2] : vector<2x8x32xf32> to vector<2x8xf32>
    %cst_10 = arith.constant dense<0xFF800000> : vector<2xf32>
    %16 = vector.multi_reduction <maximumf>, %15, %cst_10 [1] : vector<2x8xf32> to vector<2xf32>
    %17 = vector.shape_cast %16 : vector<2xf32> to vector<2x1xf32>
    %18 = vector.broadcast %17 : vector<2x1xf32> to vector<2x8xf32>
    %19 = arith.subf %15, %18 : vector<2x8xf32>
    %20 = math.exp %19 : vector<2x8xf32>
    %cst_11 = arith.constant dense<0.000000e+00> : vector<2xf32>
    %21 = vector.multi_reduction <add>, %20, %cst_11 [1] : vector<2x8xf32> to vector<2xf32>
    %22 = vector.shape_cast %21 : vector<2xf32> to vector<2x1xf32>
    %23 = vector.broadcast %22 : vector<2x1xf32> to vector<2x8xf32>
    %24 = arith.divf %20, %23 : vector<2x8xf32>
    %c0_12 = arith.constant 0 : index
    %c0_13 = arith.constant 0 : index
    %25 = vector.load %arg6[%c0_12, %c0_13] : memref<2x8xf32, #tpu.memory_space<vmem>>, vector<2x8xf32>
    tpu.vector_store %arg6[%c0_12, %c0_13], %24 {strides = array<i32>} : memref<2x8xf32, #tpu.memory_space<vmem>>, vector<2x8xf32>,
    return
  }
  func.func @transform_0(%arg0: i32, %arg1: i32) -> (i32, i32) {
    %c0_i32 = arith.constant 0 : i32
    %c0_i32_0 = arith.constant 0 : i32
    return %arg0, %c0_i32 : i32, i32
  }
  func.func @transform_1(%arg0: i32, %arg1: i32) -> (i32, i32, i32) {
    %c0_i32 = arith.constant 0 : i32
    %c0_i32_0 = arith.constant 0 : i32
    return %arg0, %arg1, %c0_i32 : i32, i32, i32
  }
  func.func @transform_2(%arg0: i32, %arg1: i32) -> (i32, i32) {
    %c0_i32 = arith.constant 0 : i32
    %c0_i32_0 = arith.constant 0 : i32
    %c0_i32_1 = arith.constant 0 : i32
    return %c0_i32, %c0_i32_0 : i32, i32
  }
  func.func @transform_3(%arg0: i32, %arg1: i32) -> (i32, i32) {
    %c0_i32 = arith.constant 0 : i32
    %c0_i32_0 = arith.constant 0 : i32
    %c0_i32_1 = arith.constant 0 : i32
    return %c0_i32, %c0_i32_0 : i32, i32
  }
  func.func @transform_4(%arg0: i32, %arg1: i32) -> (i32, i32) {
    %c0_i32 = arith.constant 0 : i32
    return %arg0, %arg1 : i32, i32
  }
}

</mosaic_0001>

<bundles_post_ra>
// kernel: tpu_custom_call.1
= control target key start
LH: loop header
LB: loop body
LE: loop exit
PB: predicated region body
PF: predicated region fallthrough
CT: control target
= control target key end

     0   :  { %9 = vsyncpa [#allocation3], 0  ;;  %s488_s0 = inlined_call_operand.hbm [shape: f32[2,32], index: 0, kind: input, shape index: {}]   ;;  %s489_s1 = inlined_call_operand.hbm [shape: f32[2,8,32], index: 1, kind: input, shape index: {}]   ;;  %s490_s2 = inlined_call_operand.hbm [shape: f32[32,32], index: 2, kind: input, shape index: {}]   ;;  %s491_s3 = inlined_call_operand.vmem [shape: f32[1,32], index: 3, kind: input, shape index: {}]   ;;  %s492_s4 = inlined_call_operand.hbm [shape: f32[2,8], index: 4, kind: output, shape index: {}]  }
   0x1   :  { %10 = vsyncpa [#allocation6], 0 }
   0x2   :  { %11 = vsyncpa [#allocation4], 0  ;;  %s430_s15 = smov [#allocation5]  }
   0x3   :  { %s27_s16 = sshll.u32 %s430_s15, 4  ;;  %s28_s16 = int_to_ptr.vmem [resolvable:$true] %s27_s16 }
   0x4   :  { %s352_s17 = scalar_lea.vmem %s28_s16, 256  ;;  %p357_p1 = scmp.lt.s32.totalorder %s28_s16, %s28_s16 }
   0x5   :  { %p353_p0 = scmp.ne.s32.totalorder %s28_s16, %s352_s17  ;;  %p358_p2 = scmp.lt.s32.totalorder %s352_s17, %s352_s17 }
   0x7   :  { %p359_p3 = por %p358_p2, %p357_p1 }
   0x9   :  { %p360_p4 = pnand %p359_p3, %p353_p0 }
   0xb   :  { %363 = shalt.err (!%p360_p4)
}
   0xc   :  { %s431_s18 = smov 128   ;;  %s432_s19 = smov 8  }
   0xd   :  { %33 = dma.hbm_to_vmem [thread:$0]  %s489_s1, 256, %s28_s16, [#allocation6], %s431_s18, %s431_s18, %s432_s19  }
   0xe   :  { %s433_s22 = smov [#allocation2]   ;;  %s434_s24 = smov [#allocation7]  }
   0xf   :  { %s18_s23 = sshll.u32 %s433_s22, 4  ;;  %s39_s25 = sshll.u32 %s434_s24, 4  ;;  %s19_s23 = int_to_ptr.vmem [resolvable:$true] %s18_s23  ;;  %s40_s25 = int_to_ptr.vmem [resolvable:$true] %s39_s25 }
  0x10   :  { %s372_s26 = scalar_lea.vmem %s19_s23, 32  ;;  %p377_p6 = scmp.lt.s32.totalorder %s19_s23, %s19_s23 }
  0x11   :  { %p373_p5 = scmp.ne.s32.totalorder %s19_s23, %s372_s26  ;;  %p378_p7 = scmp.lt.s32.totalorder %s372_s26, %s372_s26 }
  0x13   :  { %p379_p8 = por %p378_p7, %p377_p6 }
  0x15   :  { %p380_p9 = pnand %p379_p8, %p373_p5 }
  0x17   :  { %383 = shalt.err (!%p380_p9)
}
  0x18   :  { %21 = dma.hbm_to_vmem [thread:$0]  %s488_s0, 32, %s19_s23, [#allocation3]  }
  0x19   :  { %s392_s29 = scalar_lea.vmem %s40_s25, 512  ;;  %p397_p11 = scmp.lt.s32.totalorder %s40_s25, %s40_s25 }
  0x1a   :  { %p393_p10 = scmp.ne.s32.totalorder %s40_s25, %s392_s29  ;;  %p398_p12 = scmp.lt.s32.totalorder %s392_s29, %s392_s29 }
  0x1c   :  { %p399_p13 = por %p398_p12, %p397_p11 }
  0x1e   :  { %p400_p0 = pnand %p399_p13, %p393_p10 }
  0x20   :  { %403 = shalt.err (!%p400_p0)
}
  0x21   :  { %45 = dma.hbm_to_vmem [thread:$0]  %s490_s2, 512, %s40_s25, [#allocation6], %s431_s18, %s431_s18, %s432_s19  }
  0x22   :  { %424 = dma.done.wait [#allocation3], 32  }
  0x23   :  { %425 = vsyncadd [#allocation3], 4294967264 }
  0x24   :  { %426 = dma.done.wait [#allocation6], 768  }
  0x25   :  { %427 = vsyncadd [#allocation6], 4294966528  ;;  %vm63_vm0 = vcmask 261120   ;;  %v62_v0 = vld [vmem:[#allocation7 + $0x18] sm:$0xff]  ;;  %v61_v1 = vld [vmem:[#allocation7 + $0x10] sm:$0xff]  ;;  %v158_v8 = vlaneseq  ;;  %vm210_vm1 = vcmask 1041409  }
  0x26   :  { %315 = vmatprep.subr.mxu0 %v62_v0  ;;  %v57_v2 = vld [vmem:[#allocation5] sm:$0xff]  ;;  %v60_v3 = vld [vmem:[#allocation7 + $0x8] sm:$0xff]  ;;  %v59_v4 = vld [vmem:[#allocation7] sm:$0xff]  ;;  %v435_v6 = vmov 1966171168   ;;  %vm213_vm2 = vcmask 58368  }
  0x27   :  { %316 = vmatpush3.msra.mxu0 %v62_v0  ;;  %323 = vmatprep.mubr.msk.f32.mxu0 %vm63_vm0, %v57_v2  ;;  %v58_v5 = vld [vmem:[#allocation5 + $0x8] sm:$0xff]  ;;  %v156_v7 = vunpack.c.l.s4 %v435_v6  ;;  %v159_v10 = vshrl.u32 %v158_v8, 7  ;;  %v307_v11 = vld.sshfl [vmem:[#allocation2] sm:$0x11 pattern:$0x75316420] }
  0x28   :  { %317 = vmatprep.subr.mxu0 %v61_v1  ;;  %v154_v12 = vcombine.high %v307_v11, %v307_v11  ;;  %v308_v25 = vld [vmem:[%s491_s3] ss:$0 sm:$0xff]  ;;  %v201_v30 = vand.u32 127, %v158_v8  ;;  %v436_v38 = vmov 0   ;;  %s437_s3 = smov [#allocation8]  }
  0x29   :  { %318 = vmatpush3.msra.mxu0 %v61_v1  ;;  %v157_v9 = vunpack.c.0.s8 %v156_v7  ;;  %v171_v15 = vsub.s32 0, %v159_v10  ;;  %335 = vset.pattern.permute.xlu0 %v436_v38  ;;  %v224_v39 = vsub.s32 1, %v159_v10  ;;  %s295_s5 = sshll.u32 %s437_s3, 4  ;;  %s296_s5 = int_to_ptr.vmem [resolvable:$true] %s295_s5 }
  0x2a   :  { %319 = vmatprep.subr.mxu0 %v60_v3  ;;  %v204_v32 = vsub.s32 %v201_v30, %v159_v10  ;;  %334 = vset.pattern.permute.xlu1 %v436_v38  ;;  %s404_s6 = scalar_lea.vmem %s296_s5, 32  ;;  %p409_p2 = scmp.lt.s32.totalorder %s296_s5, %s296_s5 }
  0x2b   :  { %320 = vmatpush3.msra.mxu0 %v60_v3  ;;  %v160_v13 = vsub.s32 %v157_v9, %v159_v10  ;;  %p405_p1 = scmp.ne.s32.totalorder %s296_s5, %s404_s6  ;;  %p410_p3 = scmp.lt.s32.totalorder %s404_s6, %s404_s6 }
  0x2c   :  { %321 = vmatprep.subr.mxu0 %v59_v4 }
  0x2d   :  { %322 = vmatpush3.msra.mxu0 %v59_v4  ;;  %v168_v14 = vrot.slane %v154_v12, %v160_v13  ;;  %v161_v16 = vrot.slane %v307_v11, %v160_v13  ;;  %p411_p4 = por %p410_p3, %p409_p2 }
  0x2e   :  { %324 = vmatmul.mubr.msk.f32.vlgmr.msra.gmra.mxu0 %vm63_vm0, %v58_v5 }
  0x2f   :  { %v176_v17 = vrot.slane %v168_v14, %v171_v15  ;;  %v172_v18 = vrot.slane %v161_v16, %v171_v15  ;;  %p412_p5 = pnand %p411_p4, %p405_p1 }
  0xee   :  { %v325_v19 = vpop.f32.mrf.mxu0 }
  0xef   :  { %v180_v20 = vadd.f32 %v325_v19, %v176_v17 }
  0xf0   :  { %v136_v21 = vpop.f32.mrf.mxu0 }
  0xf1   :  { %v179_v22 = vadd.f32 %v172_v18, %v136_v21  ;;  %v182_v23 = vmax.f32 %v180_v20, 0.0 }
  0xf3   :  { %v181_v24 = vmax.f32 %v179_v22, 0.0  ;;  %v191_v28 = vmul.f32 %v308_v25, %v182_v23 }
  0xf5   :  { %v190_v26 = vmul.f32 %v308_v25, %v181_v24  ;;  %v195_v29 = vsel %vm63_vm0, %v191_v28, 0.0 }
  0xf7   :  { %v192_v27 = vsel %vm63_vm0, %v190_v26, 0.0 }
  0xf8   :  { %193 = vadd.xlane.f32.xlu0 %v192_v27 }
  0xfc   :  { %196 = vadd.xlane.f32.xlu0 %v195_v29 }
 0x181   :  { %v194_v31 = vpop.xlane.xlu0 %193 }
 0x182   :  { %v205_v34 = vrot.slane %v194_v31, %v204_v32 }
 0x185   :  { %v197_v33 = vpop.xlane.xlu0 %196 }
 0x186   :  { %v209_v35 = vrot.slane %v197_v33, %v204_v32 }
 0x188   :  { %v211_v36 = vsel %vm210_vm1, %v209_v35, %v205_v34 }
 0x189   :  { %v214_v37 = vsel %vm213_vm2, %v211_v36, -inf }
 0x18a   :  { %215 = vmax.xlane.f32.xlu1 %v214_v37 }
 0x213   :  { %v216_v40 = vpop.xlane.xlu1 %215 }
 0x214   :  { %v221_v41 = vrot.slane %v216_v40, %v171_v15  ;;  %v225_v42 = vrot.slane %v216_v40, %v224_v39 }
 0x216   :  { %v228_v43 = vsub.f32 %v194_v31, %v221_v41  ;;  %v229_v44 = vsub.f32 %v197_v33, %v225_v42 }
 0x218   :  { %v230_v45 = vmul.f32 1.442695, %v228_v43  ;;  %v232_v46 = vmul.f32 1.442695, %v229_v44 }
 0x21a   :  { %336 = vpow2.f32 %v230_v45 }
 0x21b   :  { %338 = vpow2.f32 %v232_v46 }
 0x227   :  { %v337_v47 = vpop.eup %336 }
 0x228   :  { %v339_v48 = vpop.eup %338  ;;  %237 = vperm.xlu1 %334, %v337_v47  }
 0x229   :  { %240 = vperm.xlu0 %335, %v339_v48  }
 0x2a3   :  { %v238_v49 = vpop.permute.xlu1 %237 }
 0x2a4   :  { %v241_v50 = vpop.permute.xlu0 %240  ;;  %v245_v51 = vrot.slane %v238_v49, %v204_v32 }
 0x2a5   :  { %v249_v52 = vrot.slane %v241_v50, %v204_v32 }
 0x2a7   :  { %v250_v53 = vsel %vm210_vm1, %v249_v52, %v245_v51 }
 0x2a8   :  { %v252_v54 = vsel %vm213_vm2, %v250_v53, 0.0 }
 0x2a9   :  { %253 = vadd.xlane.f32.xlu1 %v252_v54 }
 0x332   :  { %v254_v55 = vpop.xlane.xlu1 %253 }
 0x333   :  { %v259_v56 = vrot.slane %v254_v55, %v171_v15  ;;  %v263_v57 = vrot.slane %v254_v55, %v224_v39 }
 0x335   :  { %340 = vrcp.f32 %v259_v56 }
 0x336   :  { %342 = vrcp.f32 %v263_v57 }
 0x342   :  { %v341_v58 = vpop.eup %340 }
 0x343   :  { %v267_v59 = vmul.f32 %v341_v58, %v337_v47  ;;  %v343_v60 = vpop.eup %342 }
 0x344   :  { %v269_v61 = vmul.f32 %v343_v60, %v339_v48 }
 0x345   :  { %273 = vperm.xlu0 %335, %v267_v59  }
 0x349   :  { %276 = vperm.xlu0 %335, %v269_v61  }
 0x3c0   :  { %v274_v62 = vpop.permute.xlu0 %273 }
 0x3c1   :  { %v281_v0 = vrot.slane %v274_v62, %v204_v32 }
 0x3c4   :  { %v277_v63 = vpop.permute.xlu0 %276 }
 0x3c5   :  { %v285_v1 = vrot.slane %v277_v63, %v204_v32 }
 0x3c7   :  { %v286_v2 = vsel %vm210_vm1, %v285_v1, %v281_v0 }
 0x3c8   :  { %288 = vst.msk [vmem:[#allocation8] sm:$0x3] %vm213_vm2, %v286_v2 }
 0x3c9   :  { %415 = shalt.err (!%p412_p5)
}
 0x3ca   :  { %298 = dma.vmem_to_hbm [thread:$0]  %s296_s5, 32, %s492_s4, [#allocation4]  }
 0x3cb   :  { %428 = dma.done.wait [#allocation4], 32  }
 0x3cc   :  { %429 = vsyncadd [#allocation4], 4294967264 }
 0x3cd   :  { %302 = vsyncpa [#allocation3], 1 }
 0x3ce   :  { %303 = vsyncpa [#allocation6], 1 }
 0x3cf   :  { %304 = vsyncpa [#allocation4], 1 }

</bundles_post_ra>
